<compile_context>
chip_gen: v7x
topology: tpu7x:2x2x1
jax: 0.10.0
libtpu: 0.0.40
codegen_flags: <defaults>
</compile_context>

<pallas_src>
import functools
import math

import jax
import jax.numpy as jnp
from jax.experimental import pallas as pl
from jax.experimental.pallas import tpu as pltpu

_MIB = 1024 * 1024


def _round_hidden(dim: int, hidden_dim, multiple_of: int) -> int:
    """Mirrors the hidden_dim computation in FeedForward.__init__."""
    if hidden_dim is None:
        hidden_dim = 4 * dim
        hidden_dim = int(2 * hidden_dim / 3)
        hidden_dim = multiple_of * ((hidden_dim + multiple_of - 1) // multiple_of)
    return hidden_dim


def _round_up(x: int, m: int) -> int:
    return ((x + m - 1) // m) * m


def _device_class() -> str:
    try:
        kind = jax.devices()[0].device_kind.lower()
    except Exception:
        kind = ""
    if "v7" in kind or "7x" in kind:
        return "v7x"
    if "v5e" in kind or "v5 lite" in kind or "v5lite" in kind:
        return "v5e"
    return "v6e"  # 128 MiB-VMEM class default (v6e, v5p, unknown)


# (default tm, default th, VMEM clamp)
_TILE_DEFAULTS = {
    "v7x": (512, 256, 56 * _MIB),    # 64 MiB physical VMEM: leave Mosaic headroom
    "v6e": (1024, 512, 110 * _MIB),  # AI = tm FLOP/B clears ~700 FLOP/B crossover
    "v5e": (384, 1024, 110 * _MIB),  # crossover ~240 FLOP/B; big th -> fewer steps
}


def _vmem_estimate(tm: int, th: int, dim: int, itemsize: int) -> int:
    """Double-buffered I/O tiles + f32 accumulator + f32 intermediates."""
    dbl = 2
    io = dbl * itemsize * (tm * dim          # x tile
                           + dim * 2 * th    # fused W1|W3 slab
                           + th * dim        # W2 slab
                           + tm * dim)       # out tile
    acc = 4 * tm * dim                       # f32 accumulator scratch
    temps = 4 * 4 * tm * th                  # h13 (tm,2*th) f32 + gated h + cast
    return io + acc + temps


def _pick_config(M: int, dim: int, hidden: int, itemsize: int, tm=None, th=None):
    chip = _device_class()
    d_tm, d_th, cap = _TILE_DEFAULTS[chip]
    tm = d_tm if tm is None else tm
    th = d_th if th is None else th

    # Round the token-tile clamp to the dtype's native sublane packing.
    sub = {4: 8, 2: 16, 1: 32}.get(itemsize, 8)
    tm_eff = min(tm, _round_up(M, sub))

    # v7x decode shapes: ensure >=2 token tiles so both TensorCores have work
    # (each streams half the weights -> up to ~2x on weight-DMA-bound decode).
    if chip == "v7x" and M > sub and -(-M // tm_eff) < 2:
        tm_eff = min(tm_eff, _round_up(-(-M // 2), sub))

    # Hidden slab: 128-aligned, never larger than (rounded) hidden.
    th_eff = _round_up(min(th, hidden), 128)

    def fits(tm_, th_):
        e = _vmem_estimate(tm_, th_, dim, itemsize)
        return e + e // 4 <= cap

    # Shrink tiles until the footprint (plus headroom) fits the per-chip cap.
    while not fits(tm_eff, th_eff):
        if tm_eff > max(256, sub):
            tm_eff = max(_round_up(tm_eff // 2, sub), sub)
        elif th_eff > 128:
            th_eff = _round_up(th_eff // 2, 128)
        elif tm_eff > sub:
            tm_eff = max(_round_up(tm_eff // 2, sub), sub)
        else:
            break

    est = _vmem_estimate(tm_eff, th_eff, dim, itemsize)
    vmem_limit = int(min(cap, max(32 * _MIB, est + est // 4)))
    return tm_eff, th_eff, vmem_limit


def _ffn_kernel(x_ref, w13_ref, w2_ref, o_ref, acc_ref, *, th):
    """Grid = (token tiles, hidden slabs). Accumulate partial w2 products in f32."""
    j = pl.program_id(1)

    @pl.when(j == 0)
    def _init():
        acc_ref[...] = jnp.zeros_like(acc_ref)

    x = x_ref[...]                                                      # (tm, dim)
    # One fused MXU push / one DMA stream for W1|W3: (tm, dim) @ (dim, 2*th).
    h13 = jnp.dot(x, w13_ref[...], preferred_element_type=jnp.float32)  # (tm, 2*th)
    h1 = h13[:, :th]          # static, lane-aligned slices (th is a 128-multiple)
    h3 = h13[:, th:]
    # SiLU (EUP sigmoid) + gating in f32; cast only for the MXU feed of w2.
    h = (h1 * jax.nn.sigmoid(h1)) * h3
    acc_ref[...] += jnp.dot(h.astype(x.dtype), w2_ref[...],
                            preferred_element_type=jnp.float32)          # (tm, dim)

    @pl.when(j == pl.num_programs(1) - 1)
    def _finalize():
        o_ref[...] = acc_ref[...].astype(o_ref.dtype)
    # TODO(synk): training-mode dropout (stateful PRNG mask) not implemented;
    # inference semantics (dropout = identity) are reproduced exactly.


@functools.partial(jax.jit,
                   static_argnames=("tm", "th", "vmem_limit", "compute_dtype"))
def _ffn_call(x, w1_t, w3_t, w2_t, *, tm, th, vmem_limit, compute_dtype):
    out_dtype = x.dtype
    lead = x.shape[:-1]
    dim = x.shape[-1]
    hidden = w1_t.shape[1]
    M = math.prod(lead)
    x2d = x.reshape(M, dim)

    cd = jnp.dtype(compute_dtype)
    if x2d.dtype != cd:
        x2d = x2d.astype(cd)
    w1c = w1_t.astype(cd)
    w3c = w3_t.astype(cd)
    w2c = w2_t.astype(cd)

    # --- token padding: zero rows are sliced off at the end ---
    M_pad = _round_up(M, tm)
    if M_pad != M:
        x2d = jnp.pad(x2d, ((0, M_pad - M), (0, 0)))

    # --- hidden padding (zeros contribute exactly 0 through silu/gating/w2) ---
    hidden_pad = _round_up(hidden, th)
    if hidden_pad != hidden:
        ph = hidden_pad - hidden
        w1c = jnp.pad(w1c, ((0, 0), (0, ph)))
        w3c = jnp.pad(w3c, ((0, 0), (0, ph)))
        w2c = jnp.pad(w2c, ((0, ph), (0, 0)))

    # --- per-slab interleave of W1^T / W3^T so one DMA fetches both per step ---
    # (In a real model, pre-fuse the weights once instead of per call.)
    n_slab = hidden_pad // th
    w13 = jnp.concatenate(
        [w1c.reshape(dim, n_slab, th), w3c.reshape(dim, n_slab, th)], axis=2
    ).reshape(dim, 2 * hidden_pad)

    grid = (M_pad // tm, hidden_pad // th)

    out2d = pl.pallas_call(
        functools.partial(_ffn_kernel, th=th),
        out_shape=jax.ShapeDtypeStruct((M_pad, dim), out_dtype),
        grid_spec=pltpu.PrefetchScalarGridSpec(
            num_scalar_prefetch=0,
            grid=grid,
            in_specs=[
                pl.BlockSpec((tm, dim), lambda i, j: (i, 0)),       # x tile (j-invariant)
                pl.BlockSpec((dim, 2 * th), lambda i, j: (0, j)),   # fused W1|W3 slab
                pl.BlockSpec((th, dim), lambda i, j: (j, 0)),       # W2^T slab
            ],
            out_specs=pl.BlockSpec((tm, dim), lambda i, j: (i, 0)),
            scratch_shapes=[pltpu.VMEM((tm, dim), jnp.float32)],
        ),
        compiler_params=pltpu.CompilerParams(
            dimension_semantics=("parallel", "arbitrary"),
            vmem_limit_bytes=vmem_limit,
        ),
    )(x2d, w13, w2c)

    return out2d[:M].reshape(*lead, dim)


def feed_forward(x, w1_t, w3_t, w2_t, *, tm=None, th=None, compute_dtype="auto"):
    """SwiGLU FFN.  x: (..., dim).  wK_t: transposed nn.Linear weights (in, out).

    compute_dtype="auto": f32 inputs are cast to bf16 for the matmuls (MXU
    accumulation stays f32) — halves weight HBM traffic and runs the MXU at
    full bf16 rate.  Pass an explicit dtype (e.g. jnp.float32) to override.
    """
    dim = x.shape[-1]
    hidden = w1_t.shape[1]
    M = math.prod(x.shape[:-1])

    if compute_dtype == "auto":
        cd = jnp.bfloat16 if x.dtype == jnp.float32 else x.dtype
    else:
        cd = compute_dtype
    cd = jnp.dtype(cd)

    tm_eff, th_eff, vmem_limit = _pick_config(M, dim, hidden, cd.itemsize,
                                              tm=tm, th=th)
    return _ffn_call(x, w1_t, w3_t, w2_t, tm=tm_eff, th=th_eff,
                     vmem_limit=vmem_limit, compute_dtype=cd.type)


def _ref_ffn(x, w1_t, w3_t, w2_t):
    xf = x.astype(jnp.float32)
    h1 = xf @ w1_t.astype(jnp.float32)
    h3 = xf @ w3_t.astype(jnp.float32)
    return (h1 * jax.nn.sigmoid(h1) * h3) @ w2_t.astype(jnp.float32)


if __name__ == "__main__":
    # Small deterministic config: dim=64, hidden_dim=None, multiple_of=32 -> hidden=192
    dim = 64
    multiple_of = 32
    hidden = _round_hidden(dim, None, multiple_of)   # 192

    batch, seq = 2, 8
    key = jax.random.PRNGKey(0)
    kx, k1, k2, k3 = jax.random.split(key, 4)

    x = jax.random.normal(kx, (batch, seq, dim), dtype=jnp.float32)
    # torch.nn.Linear weights are (out, in); store transposed (in, out) for the kernel.
    w1_t = jax.random.normal(k1, (dim, hidden), dtype=jnp.float32) * 0.05
    w3_t = jax.random.normal(k3, (dim, hidden), dtype=jnp.float32) * 0.05
    w2_t = jax.random.normal(k2, (hidden, dim), dtype=jnp.float32) * 0.05

    ref = _ref_ffn(x, w1_t, w3_t, w2_t)

    # --- production default: f32 inputs auto-cast to bf16 compute, f32 accumulate ---
    out_auto = jax.block_until_ready(feed_forward(x, w1_t, w3_t, w2_t))
    assert out_auto.shape == (batch, seq, dim)
    assert out_auto.dtype == x.dtype
    assert jnp.allclose(out_auto, ref, atol=3e-2, rtol=5e-2)

    # --- forced f32 compute: strict numerical check of the kernel itself ---
    out_f32 = jax.block_until_ready(
        feed_forward(x, w1_t, w3_t, w2_t, compute_dtype=jnp.float32))
    assert jnp.allclose(out_f32, ref, atol=1e-4, rtol=1e-4)

    # --- non-multiple token count exercises the padding path ---
    x_odd = x[:, :7, :]                                  # M = 14 tokens
    out_odd = jax.block_until_ready(
        feed_forward(x_odd, w1_t, w3_t, w2_t, compute_dtype=jnp.float32))
    assert out_odd.shape == (batch, 7, dim)
    assert jnp.allclose(out_odd, _ref_ffn(x_odd, w1_t, w3_t, w2_t),
                        atol=1e-4, rtol=1e-4)

    # --- bf16 inputs (recommended production dtype), loose check ---
    xb = x.astype(jnp.bfloat16)
    w1b, w3b, w2b = (w.astype(jnp.bfloat16) for w in (w1_t, w3_t, w2_t))
    out_b = jax.block_until_ready(feed_forward(xb, w1b, w3b, w2b))
    ref_b = _ref_ffn(xb, w1b, w3b, w2b)
    assert jnp.allclose(out_b.astype(jnp.float32), ref_b, atol=3e-2, rtol=5e-2)

    print("KERNEL_OK")
</pallas_src>

<mosaic_0001>
module attributes {stable_mosaic.version = 11 : i64} {
  func.func @_ffn_kernel(%arg0: i32, %arg1: i32, %arg2: memref<16x64xbf16, #tpu.memory_space<vmem>>, %arg3: memref<64x512xbf16, #tpu.memory_space<vmem>>, %arg4: memref<256x64xbf16, #tpu.memory_space<vmem>>, %arg5: memref<16x64xf32, #tpu.memory_space<vmem>>, %arg6: memref<16x64xf32, #tpu.memory_space<vmem>>) attributes {dimension_semantics = [#tpu.dimension_semantics<parallel>, #tpu.dimension_semantics<arbitrary>], iteration_bounds = array<i64: 1, 1>, scalar_prefetch = 0 : i64, scratch_operands = 1 : i64, tpu.core_type = #tpu.core_type<tc>, window_params = [{transform_indices = @transform_0, window_bounds = array<i64: 16, 64>}, {transform_indices = @transform_1, window_bounds = array<i64: 64, 512>}, {transform_indices = @transform_2, window_bounds = array<i64: 256, 64>}, {transform_indices = @transform_3, window_bounds = array<i64: 16, 64>}]} {
    %c0_i32 = arith.constant 0 : i32
    %0 = arith.cmpi eq, %arg1, %c0_i32 : i32
    %1 = arith.extui %0 : i1 to i32
    %c0_i32_0 = arith.constant 0 : i32
    %2 = arith.cmpi ne, %1, %c0_i32_0 : i32
    scf.if %2 {
      %cst_14 = arith.constant 0.000000e+00 : f32
      %24 = vector.broadcast %cst_14 : f32 to vector<16x64xf32>
      %c0_15 = arith.constant 0 : index
      %c0_16 = arith.constant 0 : index
      %25 = vector.load %arg6[%c0_15, %c0_16] : memref<16x64xf32, #tpu.memory_space<vmem>>, vector<16x64xf32>
      tpu.vector_store %arg6[%c0_15, %c0_16], %24 {strides = array<i32>} : memref<16x64xf32, #tpu.memory_space<vmem>>, vector<16x64xf32>,
    } else {
    }
    %c0 = arith.constant 0 : index
    %c0_1 = arith.constant 0 : index
    %3 = vector.load %arg2[%c0, %c0_1] : memref<16x64xbf16, #tpu.memory_space<vmem>>, vector<16x64xbf16>
    %c0_2 = arith.constant 0 : index
    %c0_3 = arith.constant 0 : index
    %4 = vector.load %arg3[%c0_2, %c0_3] : memref<64x512xbf16, #tpu.memory_space<vmem>>, vector<64x512xbf16>
    %cst = arith.constant dense<0.000000e+00> : vector<16x512xf32>
    %5 = tpu.matmul %3, %4, %cst {dimension_numbers = #tpu.dot_dimension_numbers<[1], [0], [0], [1], [0, 0, 1, 1], [], []>} : vector<16x64xbf16>, vector<64x512xbf16>, vector<16x512xf32> -> vector<16x512xf32>
    %6 = vector.extract_strided_slice %5 {offsets = [0, 0], sizes = [16, 256], strides = [1, 1]} : vector<16x512xf32> to vector<16x256xf32>
    %7 = vector.extract_strided_slice %5 {offsets = [0, 256], sizes = [16, 256], strides = [1, 1]} : vector<16x512xf32> to vector<16x256xf32>
    %8 = arith.negf %6 : vector<16x256xf32>
    %9 = math.exp %8 : vector<16x256xf32>
    %cst_4 = arith.constant 1.000000e+00 : f32
    %10 = vector.broadcast %cst_4 : f32 to vector<16x256xf32>
    %11 = arith.addf %10, %9 : vector<16x256xf32>
    %12 = arith.divf %10, %11 : vector<16x256xf32>
    %13 = arith.mulf %6, %12 : vector<16x256xf32>
    %14 = arith.mulf %13, %7 : vector<16x256xf32>
    %c0_5 = arith.constant 0 : index
    %c0_6 = arith.constant 0 : index
    %15 = vector.load %arg6[%c0_5, %c0_6] : memref<16x64xf32, #tpu.memory_space<vmem>>, vector<16x64xf32>
    %16 = arith.truncf %14 : vector<16x256xf32> to vector<16x256xbf16>
    %c0_7 = arith.constant 0 : index
    %c0_8 = arith.constant 0 : index
    %17 = vector.load %arg4[%c0_7, %c0_8] : memref<256x64xbf16, #tpu.memory_space<vmem>>, vector<256x64xbf16>
    %cst_9 = arith.constant dense<0.000000e+00> : vector<16x64xf32>
    %18 = tpu.matmul %16, %17, %cst_9 {dimension_numbers = #tpu.dot_dimension_numbers<[1], [0], [0], [1], [0, 0, 1, 1], [], []>} : vector<16x256xbf16>, vector<256x64xbf16>, vector<16x64xf32> -> vector<16x64xf32>
    %19 = arith.addf %15, %18 : vector<16x64xf32>
    %c0_10 = arith.constant 0 : index
    %c0_11 = arith.constant 0 : index
    %20 = vector.load %arg6[%c0_10, %c0_11] : memref<16x64xf32, #tpu.memory_space<vmem>>, vector<16x64xf32>
    tpu.vector_store %arg6[%c0_10, %c0_11], %19 {strides = array<i32>} : memref<16x64xf32, #tpu.memory_space<vmem>>, vector<16x64xf32>,
    %c0_i32_12 = arith.constant 0 : i32
    %21 = arith.cmpi eq, %arg1, %c0_i32_12 : i32
    %22 = arith.extui %21 : i1 to i32
    %c0_i32_13 = arith.constant 0 : i32
    %23 = arith.cmpi ne, %22, %c0_i32_13 : i32
    scf.if %23 {
      %c0_14 = arith.constant 0 : index
      %c0_15 = arith.constant 0 : index
      %24 = vector.load %arg6[%c0_14, %c0_15] : memref<16x64xf32, #tpu.memory_space<vmem>>, vector<16x64xf32>
      %c0_16 = arith.constant 0 : index
      %c0_17 = arith.constant 0 : index
      %25 = vector.load %arg5[%c0_16, %c0_17] : memref<16x64xf32, #tpu.memory_space<vmem>>, vector<16x64xf32>
      tpu.vector_store %arg5[%c0_16, %c0_17], %24 {strides = array<i32>} : memref<16x64xf32, #tpu.memory_space<vmem>>, vector<16x64xf32>,
    } else {
    }
    return
  }
  func.func @transform_0(%arg0: i32, %arg1: i32) -> (i32, i32) {
    %c0_i32 = arith.constant 0 : i32
    %c0_i32_0 = arith.constant 0 : i32
    return %arg0, %c0_i32 : i32, i32
  }
  func.func @transform_1(%arg0: i32, %arg1: i32) -> (i32, i32) {
    %c0_i32 = arith.constant 0 : i32
    %c0_i32_0 = arith.constant 0 : i32
    return %c0_i32, %arg1 : i32, i32
  }
  func.func @transform_2(%arg0: i32, %arg1: i32) -> (i32, i32) {
    %c0_i32 = arith.constant 0 : i32
    %c0_i32_0 = arith.constant 0 : i32
    return %arg1, %c0_i32 : i32, i32
  }
  func.func @transform_3(%arg0: i32, %arg1: i32) -> (i32, i32) {
    %c0_i32 = arith.constant 0 : i32
    %c0_i32_0 = arith.constant 0 : i32
    return %arg0, %c0_i32 : i32, i32
  }
}

</mosaic_0001>

<bundles_post_ra>
// kernel: _ffn_call.1
= control target key start
LH: loop header
LB: loop body
LE: loop exit
PB: predicated region body
PF: predicated region fallthrough
CT: control target
= control target key end

     0   :  { %v595_v2 = vmov 0   ;;  %vm20_vm0 = vcmask 523264   ;;  %s739_s0 = inlined_call_operand.vmem [shape: bf16[16,64], index: 0, kind: input, shape index: {}]   ;;  %s740_s1 = inlined_call_operand.vmem [shape: bf16[64,512], index: 1, kind: input, shape index: {}]   ;;  %s741_s2 = inlined_call_operand.vmem [shape: bf16[256,64], index: 2, kind: input, shape index: {}]   ;;  %s742_s3 = inlined_call_operand.hbm [shape: f32[16,64], index: 3, kind: output, shape index: {}]  }
   0x1   :  { %v514_v0 = vld [vmem:[%s740_s1 + $0x4] ss:$16 sps:$4 sm:$0xff]   ;;  %v516_v1 = vld [vmem:[%s740_s1] ss:$16 sps:$4 sm:$0xff]   ;;  %162 = vmatprep.mubr.bf16.mxu1 %v595_v2  ;;  %v529_v9 = vld [vmem:[%s740_s1 + $0xc] ss:$16 sps:$4 sm:$0xff]  }
   0x2   :  { %130 = vmatprep.subr.bf16.mxu1 %v514_v0  ;;  %v517_v3 = vld [vmem:[%s740_s1 + $0x24] ss:$16 sps:$4 sm:$0xff]   ;;  %v519_v4 = vld [vmem:[%s740_s1 + $0x20] ss:$16 sps:$4 sm:$0xff]   ;;  %v527_v11 = vld [vmem:[%s740_s1 + $0x8] ss:$16 sps:$4 sm:$0xff]  }
   0x3   :  { %131 = vmatpush1.bf16.msra.mxu1 %v516_v1  ;;  %v520_v5 = vld [vmem:[%s740_s1 + $0x44] ss:$16 sps:$4 sm:$0xff]   ;;  %v522_v6 = vld [vmem:[%s740_s1 + $0x40] ss:$16 sps:$4 sm:$0xff]   ;;  %v532_v12 = vld [vmem:[%s740_s1 + $0x2c] ss:$16 sps:$4 sm:$0xff]  }
   0x4   :  { %132 = vmatprep.subr.bf16.mxu1 %v517_v3  ;;  %v523_v7 = vld [vmem:[%s740_s1 + $0x64] ss:$16 sps:$4 sm:$0xff]   ;;  %v525_v8 = vld [vmem:[%s740_s1 + $0x60] ss:$16 sps:$4 sm:$0xff]   ;;  %v530_v13 = vld [vmem:[%s740_s1 + $0x28] ss:$16 sps:$4 sm:$0xff]  }
   0x5   :  { %v526_v10 = vld [vmem:[%s739_s0] sm:$0xff]   ;;  %v535_v14 = vld [vmem:[%s740_s1 + $0x4c] ss:$16 sps:$4 sm:$0xff]  }
   0x7   :  { %133 = vmatpush1.bf16.msra.mxu1 %v519_v4 }
   0x8   :  { %134 = vmatprep.subr.bf16.mxu1 %v520_v5 }
   0xb   :  { %135 = vmatpush1.bf16.msra.mxu1 %v522_v6 }
   0xc   :  { %136 = vmatprep.subr.bf16.mxu1 %v523_v7 }
   0xf   :  { %137 = vmatpush1.bf16.msra.mxu1 %v525_v8 }
  0x10   :  { %173 = vmatprep.subr.bf16.mxu1 %v529_v9 }
  0x12   :  { %465 = vmatmul.mubr.msk.bf16.vlgmr.msra.gmra.mrb[0].mxu1 %vm20_vm0, %v526_v10 }
  0x13   :  { %174 = vmatpush1.bf16.msra.mxu1 %v527_v11  ;;  %205 = vmatprep.mubr.bf16.mxu1 %v595_v2 }
  0x14   :  { %175 = vmatprep.subr.bf16.mxu1 %v532_v12 }
  0x15   :  { %8 = vsyncpa [#allocation4], 0  ;;  %v533_v15 = vld [vmem:[%s740_s1 + $0x48] ss:$16 sps:$4 sm:$0xff]   ;;  %v538_v16 = vld [vmem:[%s740_s1 + $0x6c] ss:$16 sps:$4 sm:$0xff]  }
  0x16   :  { %v536_v17 = vld [vmem:[%s740_s1 + $0x68] ss:$16 sps:$4 sm:$0xff]   ;;  %v539_v18 = vld [vmem:[%s741_s2 + $0x40] sm:$0xff]   ;;  %v543_v22 = vld [vmem:[%s741_s2 + $0x50] sm:$0xff]   ;;  %v596_v4 = vmov 0.0  }
  0x17   :  { %176 = vmatpush1.bf16.msra.mxu1 %v530_v13  ;;  %v540_v19 = vld [vmem:[%s741_s2] sm:$0xff]   ;;  %487 = vmatprep.subr.bf16.mxu0 %v539_v18  ;;  %v541_v20 = vld [vmem:[%s741_s2 + $0x48] sm:$0xff]   ;;  %v544_v23 = vld [vmem:[%s741_s2 + $0x10] sm:$0xff]   ;;  %21 = vst.msk [vmem:[#allocation2] sm:$0xff] %vm20_vm0, %v596_v4 }
  0x18   :  { %177 = vmatprep.subr.bf16.mxu1 %v535_v14  ;;  %488 = vmatpush3.bf16.msra.mxu0 %v540_v19  ;;  %v542_v21 = vld [vmem:[%s741_s2 + $0x8] sm:$0xff]   ;;  %v545_v24 = vld [vmem:[%s741_s2 + $0x58] sm:$0xff]   ;;  %v547_v26 = vld [vmem:[%s741_s2 + $0x60] sm:$0xff]   ;;  %22 = vst.msk [vmem:[#allocation2 + $0x8] sm:$0xff] %vm20_vm0, %v596_v4 }
  0x19   :  { %489 = vmatprep.subr.bf16.mxu0 %v541_v20  ;;  %v546_v25 = vld [vmem:[%s741_s2 + $0x18] sm:$0xff]   ;;  %v548_v27 = vld [vmem:[%s741_s2 + $0x20] sm:$0xff]   ;;  %v549_v28 = vld [vmem:[%s741_s2 + $0x68] sm:$0xff]  }
  0x1a   :  { %v550_v29 = vld [vmem:[%s741_s2 + $0x28] sm:$0xff]   ;;  %v551_v30 = vld [vmem:[%s741_s2 + $0x70] sm:$0xff]   ;;  %v553_v32 = vld [vmem:[%s741_s2 + $0x78] sm:$0xff]  }
  0x1b   :  { %178 = vmatpush1.bf16.msra.mxu1 %v533_v15  ;;  %v552_v31 = vld [vmem:[%s741_s2 + $0x30] sm:$0xff]   ;;  %v554_v33 = vld [vmem:[%s741_s2 + $0x38] sm:$0xff]   ;;  %s597_s2 = smov [#allocation3]  }
  0x1c   :  { %179 = vmatprep.subr.bf16.mxu1 %v538_v16  ;;  %490 = vmatpush3.bf16.msra.mxu0 %v542_v21  ;;  %s437_s21 = sshll.u32 %s597_s2, 4  ;;  %s438_s21 = int_to_ptr.vmem [resolvable:$true] %s437_s21 }
  0x1d   :  { %491 = vmatprep.subr.bf16.mxu0 %v543_v22  ;;  %s571_s22 = scalar_lea.vmem %s438_s21, 256  ;;  %p576_p1 = scmp.lt.s32.totalorder %s438_s21, %s438_s21 }
  0x1e   :  { %v248_v6 = vld [vmem:[#allocation2] sm:$0xff]  ;;  %p572_p0 = scmp.ne.s32.totalorder %s438_s21, %s571_s22  ;;  %p577_p2 = scmp.lt.s32.totalorder %s571_s22, %s571_s22 }
  0x1f   :  { %180 = vmatpush1.bf16.msra.mxu1 %v536_v17 }
  0x20   :  { %492 = vmatpush3.bf16.msra.mxu0 %v544_v23  ;;  %p578_p3 = por %p577_p2, %p576_p1 }
  0x21   :  { %493 = vmatprep.subr.bf16.mxu0 %v545_v24 }
  0x22   :  { %466 = vmatmul.mubr.msk.bf16.vlgmr.msra.gmra.mrb[4].mxu1 %vm20_vm0, %v526_v10  ;;  %v249_v10 = vld [vmem:[#allocation2 + $0x8] sm:$0xff]  ;;  %p579_p4 = pnand %p578_p3, %p572_p0 }
  0x24   :  { %494 = vmatpush3.bf16.msra.mxu0 %v546_v25 }
  0x25   :  { %495 = vmatprep.subr.bf16.mxu0 %v547_v26 }
  0x28   :  { %496 = vmatpush3.bf16.msra.mxu0 %v548_v27 }
  0x29   :  { %497 = vmatprep.subr.bf16.mxu0 %v549_v28 }
  0x2c   :  { %498 = vmatpush3.bf16.msra.mxu0 %v550_v29 }
  0x2d   :  { %499 = vmatprep.subr.bf16.mxu0 %v551_v30 }
  0x30   :  { %500 = vmatpush3.bf16.msra.mxu0 %v552_v31 }
  0x31   :  { %501 = vmatprep.subr.bf16.mxu0 %v553_v32 }
  0x34   :  { %502 = vmatpush3.bf16.msra.mxu0 %v554_v33 }
  0xe5   :  { %v164_v34 = vpop.f32.mrb[0].mxu1 }
  0xe6   :  { %v467_v35 = vmul.f32 -1.442695, %v164_v34  ;;  %v166_v36 = vpop.f32.mrb[1].mxu1 }
  0xe7   :  { %v468_v37 = vmul.f32 -1.442695, %v166_v36  ;;  %v168_v38 = vpop.f32.mrb[2].mxu1 }
  0xe8   :  { %555 = vpow2.f32 %v467_v35  ;;  %v469_v39 = vmul.f32 -1.442695, %v168_v38  ;;  %v170_v40 = vpop.f32.mrb[3].mxu1 }
  0xe9   :  { %557 = vpow2.f32 %v468_v37  ;;  %v470_v41 = vmul.f32 -1.442695, %v170_v40 }
  0xea   :  { %559 = vpow2.f32 %v469_v39 }
  0xeb   :  { %561 = vpow2.f32 %v470_v41 }
  0xf2   :  { %v556_v42 = vpop.eup %555 }
  0xf3   :  { %v558_v43 = vpop.eup %557  ;;  %v228_v44 = vadd.f32 1.0, %v556_v42 }
  0xf4   :  { %v560_v45 = vpop.eup %559  ;;  %v229_v46 = vadd.f32 1.0, %v558_v43 }
  0xf5   :  { %v562_v47 = vpop.eup %561  ;;  %563 = vrcp.f32 %v228_v44  ;;  %v230_v48 = vadd.f32 1.0, %v560_v45  ;;  %v207_v49 = vpop.f32.mrb[4].mxu1 }
  0xf6   :  { %565 = vrcp.f32 %v229_v46  ;;  %v231_v50 = vadd.f32 1.0, %v562_v47  ;;  %v209_v51 = vpop.f32.mrb[5].mxu1 }
  0xf7   :  { %567 = vrcp.f32 %v230_v48  ;;  %v211_v52 = vpop.f32.mrb[6].mxu1 }
  0xf8   :  { %569 = vrcp.f32 %v231_v50  ;;  %v213_v53 = vpop.f32.mrb[7].mxu1 }
  0xff   :  { %v564_v54 = vpop.eup %563 }
 0x100   :  { %v566_v55 = vpop.eup %565  ;;  %v240_v56 = vmul.f32 %v564_v54, %v164_v34 }
 0x101   :  { %v568_v57 = vpop.eup %567  ;;  %v241_v58 = vmul.f32 %v566_v55, %v166_v36 }
 0x102   :  { %v570_v59 = vpop.eup %569  ;;  %v242_v60 = vmul.f32 %v568_v57, %v168_v38  ;;  %v244_v61 = vmul.f32 %v240_v56, %v207_v49 }
 0x103   :  { %v243_v62 = vmul.f32 %v570_v59, %v170_v40  ;;  %v245_v63 = vmul.f32 %v241_v58, %v209_v51 }
 0x104   :  { %v246_v0 = vmul.f32 %v242_v60, %v211_v52 }
 0x105   :  { %v247_v1 = vmul.f32 %v243_v62, %v213_v53 }
 0x106   :  { %v250_v2 = vpack.c.bf16 %v246_v0, %v244_v61 }
 0x107   :  { %v251_v3 = vpack.c.bf16 %v247_v1, %v245_v63 }
 0x109   :  { %412 = vmatprep.mubr.bf16.mxu0 %v251_v3 }
 0x10a   :  { %413 = vmatmul.mubr.bf16.vlgmr.msra.gmra.mrb[0].mxu0 %v250_v2 }
 0x1dd   :  { %v503_v5 = vpop.f32.mrb[0].mxu0 }
 0x1de   :  { %v504_v7 = vpop.f32.mrb[1].mxu0 }
 0x1df   :  { %v505_v8 = vadd.f32 %v504_v7, %v503_v5  ;;  %v506_v9 = vpop.f32.mrb[2].mxu0 }
 0x1e0   :  { %v507_v11 = vpop.f32.mrb[3].mxu0 }
 0x1e1   :  { %v421_v12 = vadd.f32 %v505_v8, %v248_v6  ;;  %v508_v13 = vadd.f32 %v507_v11, %v506_v9 }
 0x1e3   :  { %423 = vst.msk [vmem:[#allocation2] sm:$0xff] %vm20_vm0, %v421_v12  ;;  %v422_v14 = vadd.f32 %v508_v13, %v249_v10 }
 0x1e5   :  { %424 = vst.msk [vmem:[#allocation2 + $0x8] sm:$0xff] %vm20_vm0, %v422_v14 }
 0x1ea   :  { %v428_v15 = vld [vmem:[#allocation2] sm:$0xff] }
 0x1eb   :  { %430 = vst.msk [vmem:[#allocation3] sm:$0xff] %vm20_vm0, %v428_v15 }
 0x1ec   :  { %v429_v16 = vld [vmem:[#allocation2 + $0x8] sm:$0xff] }
 0x1ed   :  { %431 = vst.msk [vmem:[#allocation3 + $0x8] sm:$0xff] %vm20_vm0, %v429_v16 }
 0x1ee   :  { %582 = shalt.err (!%p579_p4)
}
 0x1ef   :  { %s583_s1 = scalar_lea.hbm %s742_s3, 256 }
 0x1f0   :  { %p584_p5 = scmp.ne.s32.totalorder %s742_s3, %s583_s1  ;;  %p587_p6 = scmp.lt.u32.totalorder %s583_s1, %s742_s3 }
 0x1f2   :  { %p589_p7 = pnand %p587_p6, %p584_p5 }
 0x1f4   :  { %592 = shalt.err (!%p589_p7)
}
 0x1f5   :  { %s598_s29 = smov 128   ;;  %s599_s30 = smov 8  }
 0x1f6   :  { %443 = dma.vmem_to_hbm [thread:$0]  %s438_s21, 256, %s742_s3, [#allocation4], %s598_s29, %s598_s29, %s599_s30  }
 0x1f7   :  { %593 = dma.done.wait [#allocation4], 256  }
 0x1f8   :  { %594 = vsyncadd [#allocation4], 4294967040 }
 0x1f9   :  { %447 = vsyncpa [#allocation4], 1 }

</bundles_post_ra>
